<compile_context>
chip_gen: v6e
topology: v6e:2x2x1
jax: 0.10.0
libtpu: 0.0.40
codegen_flags: <defaults>
</compile_context>

<pallas_src>
import jax
import jax.numpy as jnp
import numpy as np
from jax import lax
from jax.experimental import pallas as pl
from jax.experimental.pallas import tpu as pltpu


def _hypersage_fused_kernel(x_ref, inc_ref, inv_de_ref, inv_dv_ref, *w_and_out):
    """All HyperSAGE layers fused: (intra-agg -> inter-agg -> skip -> matmul -> relu) x L."""
    *w_refs, o_ref = w_and_out

    x = x_ref[...]            # (N, Cin)  f32 node features
    b = inc_ref[...]          # (N, E)    f32 binary incidence (single copy in VMEM)
    inv_de = inv_de_ref[...]  # (E, 1)    1 / |e|     (precomputed, layer-invariant)
    inv_dv = inv_dv_ref[...]  # (N, 1)    1 / deg(v)  (precomputed, layer-invariant)

    # Python loop => fully unrolled at trace time; x stays resident on-chip
    # between layers (no HBM round trip, no extra kernel launches).
    for w_ref in w_refs:
        w = w_ref[...]        # (Cin_l, Cout)

        # Intra-edge aggregation (generalized mean, power=2) fused with the
        # inter-edge aggregation: m_e^2 == (1/|e|) * sum_v x_v^2, so the
        # intermediate sqrt(m_e) never needs to be materialized.
        # b^T @ (x*x) without a second incidence copy: contract the node axis.
        x_pow = x * x
        edge_sq = lax.dot_general(
            b, x_pow,
            dimension_numbers=(((0,), (0,)), ((), ())),
            preferred_element_type=jnp.float32,
        ) * inv_de                                                             # (E, Cin_l) == m_e^2

        # Inter-edge aggregation: generalized mean (power=2) over edges of each node.
        node_acc = jnp.dot(b, edge_sq, preferred_element_type=jnp.float32)     # (N, Cin_l)
        a_v = jnp.sqrt(node_acc * inv_dv)

        # Skip connection + linear transform + relu update.
        x = jnp.maximum(
            jnp.dot(x + a_v, w, preferred_element_type=jnp.float32), 0.0
        )                                                                      # (N, Cout)

    o_ref[...] = x


def hypersage_forward(x_0, incidence_1, weights):
    """Fused stack of HyperSAGELayer forwards (matches HyperSAGE.forward)."""
    n_nodes = x_0.shape[0]
    out_channels = weights[-1].shape[1]

    # Degree normalizations are constant across layers: compute reciprocals once
    # on the wrapper side (cheap glue) so the kernel only multiplies.
    inv_deg_e = 1.0 / jnp.sum(incidence_1, axis=0)[:, None]   # (E, 1)
    inv_deg_v = 1.0 / jnp.sum(incidence_1, axis=1)[:, None]   # (N, 1)

    vmem = pl.BlockSpec(memory_space=pltpu.MemorySpace.VMEM)

    # Small problem: whole arrays live in VMEM, single grid point, all layers and
    # all hot-path compute (both aggregation matmuls, weight matmul, relu) fused.
    # TODO(synk): for large N/E add a node-tile grid (parallel) + edge-tile
    # reduction axis (arbitrary) with BlockSpecs sized per-generation VMEM
    # (64 MiB on v7x); unnecessary at this toy size.
    return pl.pallas_call(
        _hypersage_fused_kernel,
        out_shape=jax.ShapeDtypeStruct((n_nodes, out_channels), jnp.float32),
        in_specs=[vmem] * (4 + len(weights)),
        out_specs=vmem,
    )(x_0, incidence_1, inv_deg_e, inv_deg_v, *weights)


def _reference(x_0, incidence_1, weights):
    """Pure-JAX reference mirroring the torch semantics (dense, alpha=-1, sqrt kept)."""
    x = x_0
    b = incidence_1
    deg_e = jnp.sum(b, axis=0)[:, None]
    deg_v = jnp.sum(b, axis=1)[:, None]
    for w in weights:
        m_e = jnp.sqrt((b.T @ (x * x)) / deg_e)
        a_v = jnp.sqrt((b @ (m_e * m_e)) / deg_v)
        x = jax.nn.relu((x + a_v) @ w)
    return x


if __name__ == "__main__":
    key = jax.random.PRNGKey(0)
    n_nodes, n_edges = 32, 16
    in_channels, hidden_channels, n_layers = 8, 32, 2

    k_x, k_inc, k_w = jax.random.split(key, 3)

    # Node features.
    x_0 = jax.random.normal(k_x, (n_nodes, in_channels), dtype=jnp.float32)

    # Random binary incidence; force every node in >=1 edge and every edge
    # non-empty (the reference sparse implementation assumes this).
    inc = (jax.random.uniform(k_inc, (n_nodes, n_edges)) < 0.3).astype(jnp.float32)
    inc = inc.at[jnp.arange(n_nodes), jnp.arange(n_nodes) % n_edges].set(1.0)

    # Deterministic "uniform" init of per-layer weights (stdv = 1/sqrt(out_channels)).
    # TODO(synk): alpha != -1 (random sub-sampling of a neighborhood) is not implemented;
    # the module default alpha=-1 (use all nodes) is what this kernel reproduces.
    weights = []
    ch_in = in_channels
    stdv = 1.0 / float(np.sqrt(hidden_channels))
    for wk in jax.random.split(k_w, n_layers):
        weights.append(
            jax.random.uniform(
                wk, (ch_in, hidden_channels), minval=-stdv, maxval=stdv, dtype=jnp.float32
            )
        )
        ch_in = hidden_channels
    weights = tuple(weights)

    out = jax.jit(hypersage_forward)(x_0, inc, weights)
    out = jax.block_until_ready(out)

    ref = _reference(x_0, inc, weights)
    np.testing.assert_allclose(np.asarray(out), np.asarray(ref), rtol=1e-4, atol=1e-5)
    assert out.shape == (n_nodes, hidden_channels)

    print("KERNEL_OK")
</pallas_src>

<mosaic_0001>
module attributes {stable_mosaic.version = 11 : i64} {
  func.func @_hypersage_fused_kernel(%arg0: memref<32x8xf32, #tpu.memory_space<vmem>>, %arg1: memref<32x16xf32, #tpu.memory_space<vmem>>, %arg2: memref<16x1xf32, #tpu.memory_space<vmem>>, %arg3: memref<32x1xf32, #tpu.memory_space<vmem>>, %arg4: memref<8x32xf32, #tpu.memory_space<vmem>>, %arg5: memref<32x32xf32, #tpu.memory_space<vmem>>, %arg6: memref<32x32xf32, #tpu.memory_space<vmem>>) attributes {dimension_semantics = [], scalar_prefetch = 0 : i64, scratch_operands = 0 : i64, tpu.core_type = #tpu.core_type<tc>} {
    %c0 = arith.constant 0 : index
    %c0_0 = arith.constant 0 : index
    %0 = vector.load %arg0[%c0, %c0_0] : memref<32x8xf32, #tpu.memory_space<vmem>>, vector<32x8xf32>
    %c0_1 = arith.constant 0 : index
    %c0_2 = arith.constant 0 : index
    %1 = vector.load %arg1[%c0_1, %c0_2] : memref<32x16xf32, #tpu.memory_space<vmem>>, vector<32x16xf32>
    %c0_3 = arith.constant 0 : index
    %c0_4 = arith.constant 0 : index
    %2 = vector.load %arg2[%c0_3, %c0_4] : memref<16x1xf32, #tpu.memory_space<vmem>>, vector<16x1xf32>
    %c0_5 = arith.constant 0 : index
    %c0_6 = arith.constant 0 : index
    %3 = vector.load %arg3[%c0_5, %c0_6] : memref<32x1xf32, #tpu.memory_space<vmem>>, vector<32x1xf32>
    %c0_7 = arith.constant 0 : index
    %c0_8 = arith.constant 0 : index
    %4 = vector.load %arg4[%c0_7, %c0_8] : memref<8x32xf32, #tpu.memory_space<vmem>>, vector<8x32xf32>
    %5 = arith.mulf %0, %0 : vector<32x8xf32>
    %cst = arith.constant dense<0.000000e+00> : vector<16x8xf32>
    %6 = tpu.matmul %1, %5, %cst {dimension_numbers = #tpu.dot_dimension_numbers<[0], [0], [1], [1], [0, 1, 1, 1], [], []>} : vector<32x16xf32>, vector<32x8xf32>, vector<16x8xf32> -> vector<16x8xf32>
    %7 = vector.broadcast %2 : vector<16x1xf32> to vector<16x8xf32>
    %8 = arith.mulf %6, %7 : vector<16x8xf32>
    %cst_9 = arith.constant dense<0.000000e+00> : vector<32x8xf32>
    %9 = tpu.matmul %1, %8, %cst_9 {dimension_numbers = #tpu.dot_dimension_numbers<[1], [0], [0], [1], [0, 0, 1, 1], [], []>} : vector<32x16xf32>, vector<16x8xf32>, vector<32x8xf32> -> vector<32x8xf32>
    %10 = vector.broadcast %3 : vector<32x1xf32> to vector<32x8xf32>
    %11 = arith.mulf %9, %10 : vector<32x8xf32>
    %12 = math.sqrt %11 : vector<32x8xf32>
    %13 = arith.addf %0, %12 : vector<32x8xf32>
    %cst_10 = arith.constant dense<0.000000e+00> : vector<32x32xf32>
    %14 = tpu.matmul %13, %4, %cst_10 {dimension_numbers = #tpu.dot_dimension_numbers<[1], [0], [0], [1], [0, 0, 1, 1], [], []>} : vector<32x8xf32>, vector<8x32xf32>, vector<32x32xf32> -> vector<32x32xf32>
    %cst_11 = arith.constant 0.000000e+00 : f32
    %15 = vector.broadcast %cst_11 : f32 to vector<32x32xf32>
    %16 = arith.maximumf %14, %15 : vector<32x32xf32>
    %c0_12 = arith.constant 0 : index
    %c0_13 = arith.constant 0 : index
    %17 = vector.load %arg5[%c0_12, %c0_13] : memref<32x32xf32, #tpu.memory_space<vmem>>, vector<32x32xf32>
    %18 = arith.mulf %16, %16 : vector<32x32xf32>
    %cst_14 = arith.constant dense<0.000000e+00> : vector<16x32xf32>
    %19 = tpu.matmul %1, %18, %cst_14 {dimension_numbers = #tpu.dot_dimension_numbers<[0], [0], [1], [1], [0, 1, 1, 1], [], []>} : vector<32x16xf32>, vector<32x32xf32>, vector<16x32xf32> -> vector<16x32xf32>
    %20 = vector.broadcast %2 : vector<16x1xf32> to vector<16x32xf32>
    %21 = arith.mulf %19, %20 : vector<16x32xf32>
    %cst_15 = arith.constant dense<0.000000e+00> : vector<32x32xf32>
    %22 = tpu.matmul %1, %21, %cst_15 {dimension_numbers = #tpu.dot_dimension_numbers<[1], [0], [0], [1], [0, 0, 1, 1], [], []>} : vector<32x16xf32>, vector<16x32xf32>, vector<32x32xf32> -> vector<32x32xf32>
    %23 = vector.broadcast %3 : vector<32x1xf32> to vector<32x32xf32>
    %24 = arith.mulf %22, %23 : vector<32x32xf32>
    %25 = math.sqrt %24 : vector<32x32xf32>
    %26 = arith.addf %16, %25 : vector<32x32xf32>
    %cst_16 = arith.constant dense<0.000000e+00> : vector<32x32xf32>
    %27 = tpu.matmul %26, %17, %cst_16 {dimension_numbers = #tpu.dot_dimension_numbers<[1], [0], [0], [1], [0, 0, 1, 1], [], []>} : vector<32x32xf32>, vector<32x32xf32>, vector<32x32xf32> -> vector<32x32xf32>
    %cst_17 = arith.constant 0.000000e+00 : f32
    %28 = vector.broadcast %cst_17 : f32 to vector<32x32xf32>
    %29 = arith.maximumf %27, %28 : vector<32x32xf32>
    %c0_18 = arith.constant 0 : index
    %c0_19 = arith.constant 0 : index
    %30 = vector.load %arg6[%c0_18, %c0_19] : memref<32x32xf32, #tpu.memory_space<vmem>>, vector<32x32xf32>
    tpu.vector_store %arg6[%c0_18, %c0_19], %29 {strides = array<i32>} : memref<32x32xf32, #tpu.memory_space<vmem>>, vector<32x32xf32>,
    return
  }
}

</mosaic_0001>

<bundles_post_ra>
// kernel: hypersage_forward.1
= control target key start
LH: loop header
LB: loop body
LE: loop exit
PB: predicated region body
PF: predicated region fallthrough
CT: control target
= control target key end

     0   :  { %v918_v9 = vmov 0   ;;  %s1129_s0 = inlined_call_operand.vmem [shape: f32[32,8], index: 0, kind: input, shape index: {}]   ;;  %s1130_s1 = inlined_call_operand.vmem [shape: f32[32,16], index: 1, kind: input, shape index: {}]   ;;  %s1131_s2 = inlined_call_operand.vmem [shape: f32[16,1], index: 2, kind: input, shape index: {}]   ;;  %s1132_s3 = inlined_call_operand.vmem [shape: f32[32,1], index: 3, kind: input, shape index: {}]   ;;  %s1133_s4 = inlined_call_operand.vmem [shape: f32[8,32], index: 4, kind: input, shape index: {}]   ;;  %s1134_s5 = inlined_call_operand.vmem [shape: f32[32,32], index: 5, kind: input, shape index: {}]   ;;  %s1135_s6 = inlined_call_operand.hbm [shape: f32[32,32], index: 6, kind: output, shape index: {}]  }
   0x1   :  { %v960_v0 = vld [vmem:[%s1130_s1] sm:$0xff]  ;;  %v966_v1 = vld [vmem:[%s1129_s0 + $0x18] sm:$0xff]  ;;  %v971_v2 = vld [vmem:[%s1129_s0 + $0x10] sm:$0xff]  ;;  %878 = vset.pattern.permute.xlu1 %v918_v9 }
   0x2   :  { %43 = vxpose.xlu0.b32.start [1/4] (short) (narrow) %v960_v0, 16  ;;  %v976_v3 = vld [vmem:[%s1130_s1 + $0x8] sm:$0xff]  ;;  %v42_v4 = vmul.f32 %v966_v1, %v966_v1  ;;  %v41_v5 = vmul.f32 %v971_v2, %v971_v2  ;;  %v993_v8 = vld [vmem:[%s1129_s0] sm:$0xff] }
   0x3   :  { %v985_v6 = vld [vmem:[%s1129_s0 + $0x8] sm:$0xff] }
   0x4   :  { %v33_v7 = vld [vmem:[%s1131_s2 + $0x8] sm:$0xff]  ;;  %809 = vmatprep.subr.mxu0 %v42_v4  ;;  %v40_v10 = vmul.f32 %v985_v6, %v985_v6 }
   0x5   :  { %164 = vperm.xlu1 %878, %v33_v7  }
   0x6   :  { %11 = vsyncpa [#allocation3], 0  ;;  %44 = vxpose.xlu0.b32.cont [2/4] (short) (narrow) %v976_v3, 16  ;;  %810 = vmatpush3.msra.mxu0 %v42_v4  ;;  %v32_v11 = vld [vmem:[%s1131_s2] sm:$0xff]  ;;  %v1004_v12 = vld [vmem:[%s1130_s1 + $0x10] sm:$0xff]  ;;  %v39_v13 = vmul.f32 %v993_v8, %v993_v8  ;;  %vm75_vm0 = vcmask 261120  }
   0x7   :  { %811 = vmatprep.subr.mxu0 %v41_v5  ;;  %v34_v14 = vld [vmem:[%s1132_s3] sm:$0xff]  ;;  %v1015_v15 = vld [vmem:[%s1130_s1 + $0x18] sm:$0xff]  ;;  %v35_v16 = vld [vmem:[%s1132_s3 + $0x8] sm:$0xff]  ;;  %vm169_vm1 = vcmask 130048   ;;  %vm323_vm6 = vcmask 64512  }
   0x8   :  { %812 = vmatpush3.msra.mxu0 %v41_v5  ;;  %v37_v17 = vld [vmem:[%s1132_s3 + $0x18] sm:$0xff]  ;;  %824 = vmatprep.mubr.msk.f32.mxu1 %vm169_vm1, %v960_v0  ;;  %v36_v20 = vld [vmem:[%s1132_s3 + $0x10] sm:$0xff]  ;;  %v38_v27 = vld [vmem:[%s1133_s4] sm:$0xff] }
   0x9   :  { %813 = vmatprep.subr.mxu0 %v40_v10  ;;  %159 = vperm.xlu1 %878, %v32_v11  }
   0xa   :  { %45 = vxpose.xlu0.b32.cont [3/4] (short) (narrow) %v1004_v12, 16  ;;  %814 = vmatpush3.msra.mxu0 %v40_v10 }
   0xb   :  { %815 = vmatprep.subr.mxu0 %v39_v13 }
   0xc   :  { %816 = vmatpush3.msra.mxu0 %v39_v13 }
   0xd   :  { %269 = vperm.xlu1 %878, %v34_v14   ;;  %830 = vmatprep.subr.mxu0 %v38_v27 }
   0xe   :  { %46 = vxpose.xlu0.b32.end [4/4] (short) (narrow) %v1015_v15, 16 }
  0x11   :  { %274 = vperm.xlu1 %878, %v35_v16  }
  0x15   :  { %284 = vperm.xlu1 %878, %v37_v17  }
  0x37   :  { %879 = vset.pattern.permute.xlu0 %v918_v9 }
  0x38   :  { %279 = vperm.xlu0 %879, %v36_v20  }
  0x7e   :  { %v59_v18 = vpop.trf.xlu0 }
  0x7f   :  { %817 = vmatprep.mubr.msk.f32.mxu0 %vm75_vm0, %v59_v18 }
  0x80   :  { %v1034_v21 = vpop.permute.xlu1 %164 }
  0x82   :  { %v1025_v19 = vpop.trf.xlu0 }
  0x83   :  { %818 = vmatmul.mubr.msk.f32.vlgmr.msra.gmra.mxu0 %vm75_vm0, %v1025_v19 }
  0x84   :  { %v1037_v24 = vpop.permute.xlu1 %159  ;;  %831 = vmatpush3.msra.mxu0 %v38_v27 }
  0x88   :  { %v1050_v28 = vpop.permute.xlu1 %269 }
  0x8c   :  { %v1052_v29 = vpop.permute.xlu1 %274 }
  0x90   :  { %v1055_v33 = vpop.permute.xlu1 %284 }
  0xb3   :  { %v1058_v36 = vpop.permute.xlu0 %279 }
 0x143   :  { %v819_v22 = vpop.f32.mrf.mxu0 }
 0x144   :  { %v168_v23 = vmul.f32 %v819_v22, %v1034_v21 }
 0x145   :  { %v148_v25 = vpop.f32.mrf.mxu0 }
 0x146   :  { %v167_v26 = vmul.f32 %v1037_v24, %v148_v25  ;;  %820 = vmatprep.subr.mxu1 %v168_v23 }
 0x147   :  { %821 = vmatpush3.msra.mxu1 %v168_v23 }
 0x148   :  { %822 = vmatprep.subr.mxu1 %v167_v26 }
 0x149   :  { %823 = vmatpush3.msra.mxu1 %v167_v26 }
 0x14a   :  { %825 = vmatmul.mubr.msk.f32.vlgmr.msra.gmra.mxu1 %vm169_vm1, %v976_v3 }
 0x14b   :  { %827 = vmatprep.mubr.msk.f32.mxu1 %vm169_vm1, %v1004_v12 }
 0x14e   :  { %828 = vmatmul.mubr.msk.f32.gmra.mxu1 %vm169_vm1, %v1015_v15 }
 0x14f   :  { %846 = vmatprep.mubr.msk.f32.mxu1 %vm75_vm0, %v59_v18 }
 0x20a   :  { %v826_v30 = vpop.f32.mrf.mxu1 }
 0x20b   :  { %v288_v31 = vmul.f32 %v826_v30, %v1052_v29 }
 0x20c   :  { %v248_v32 = vpop.f32.mrf.mxu1 }
 0x20d   :  { %880 = vrsqrt.f32 %v288_v31  ;;  %v287_v34 = vmul.f32 %v1050_v28, %v248_v32  ;;  %vm300_vm2 = vcmp.eq.f32.partialorder %v288_v31, inf  ;;  %v303_v45 = vand.u32 2147483648, %v288_v31 }
 0x20e   :  { %v829_v35 = vpop.f32.mrf.mxu1  ;;  %vm302_vm4 = vcmp.eq.f32.partialorder %v288_v31, 0.0 }
 0x20f   :  { %882 = vrsqrt.f32 %v287_v34  ;;  %v290_v37 = vmul.f32 %v829_v35, %v1055_v33  ;;  %vm293_vm3 = vcmp.eq.f32.partialorder %v287_v34, inf  ;;  %v296_v47 = vand.u32 2147483648, %v287_v34 }
 0x210   :  { %v258_v38 = vpop.f32.mrf.mxu1  ;;  %vm295_vm5 = vcmp.eq.f32.partialorder %v287_v34, 0.0 }
 0x211   :  { %884 = vrsqrt.f32 %v290_v37  ;;  %v289_v39 = vmul.f32 %v1058_v36, %v258_v38  ;;  %vm314_vm7 = vcmp.eq.f32.partialorder %v290_v37, inf  ;;  %v317_v56 = vand.u32 2147483648, %v290_v37 }
 0x212   :  { %vm316_vm9 = vcmp.eq.f32.partialorder %v290_v37, 0.0 }
 0x213   :  { %886 = vrsqrt.f32 %v289_v39  ;;  %vm307_vm8 = vcmp.eq.f32.partialorder %v289_v39, inf  ;;  %v310_v58 = vand.u32 2147483648, %v289_v39  ;;  %vm309_vm10 = vcmp.eq.f32.partialorder %v289_v39, 0.0 }
 0x21a   :  { %v881_v40 = vpop.eup %880 }
 0x21b   :  { %v299_v41 = vmul.f32 %v881_v40, %v288_v31 }
 0x21c   :  { %v883_v42 = vpop.eup %882 }
 0x21d   :  { %v292_v43 = vmul.f32 %v883_v42, %v287_v34  ;;  %v301_v44 = vsel %vm300_vm2, %v288_v31, %v299_v41 }
 0x21e   :  { %v885_v46 = vpop.eup %884  ;;  %v304_v49 = vsel %vm302_vm4, %v303_v45, %v301_v44 }
 0x21f   :  { %v294_v48 = vsel %vm293_vm3, %v287_v34, %v292_v43  ;;  %v313_v50 = vmul.f32 %v885_v46, %v290_v37  ;;  %v320_v57 = vadd.f32 %v304_v49, %v985_v6 }
 0x220   :  { %v887_v51 = vpop.eup %886  ;;  %v297_v52 = vsel %vm295_vm5, %v296_v47, %v294_v48 }
 0x221   :  { %v319_v53 = vadd.f32 %v297_v52, %v993_v8  ;;  %v306_v54 = vmul.f32 %v887_v51, %v289_v39  ;;  %v315_v55 = vsel %vm314_vm7, %v290_v37, %v313_v50 }
 0x222   :  { %v318_v60 = vsel %vm316_vm9, %v317_v56, %v315_v55 }
 0x223   :  { %832 = vmatprep.mubr.msk.f32.mxu0 %vm323_vm6, %v319_v53  ;;  %v308_v59 = vsel %vm307_vm8, %v289_v39, %v306_v54  ;;  %v322_v63 = vadd.f32 %v318_v60, %v966_v1 }
 0x224   :  { %833 = vmatmul.mubr.msk.f32.vlgmr.msra.gmra.mxu0 %vm323_vm6, %v320_v57  ;;  %v311_v61 = vsel %vm309_vm10, %v310_v58, %v308_v59 }
 0x225   :  { %v321_v62 = vadd.f32 %v311_v61, %v971_v2 }
 0x227   :  { %835 = vmatprep.mubr.msk.f32.mxu0 %vm323_vm6, %v321_v62 }
 0x228   :  { %836 = vmatmul.mubr.msk.f32.gmra.mxu0 %vm323_vm6, %v322_v63 }
 0x2e4   :  { %v834_v4 = vpop.f32.mrf.mxu0 }
 0x2e5   :  { %v1072_v9 = vmax.f32 %v834_v4, 0.0 }
 0x2e6   :  { %v402_v5 = vpop.f32.mrf.mxu0 }
 0x2e7   :  { %v1078_v2 = vmax.f32 %v402_v5, 0.0  ;;  %v430_v13 = vmul.f32 %v1072_v9, %v1072_v9 }
 0x2e8   :  { %v837_v6 = vpop.f32.mrf.mxu0 }
 0x2e9   :  { %v1070_v7 = vmax.f32 %v837_v6, 0.0  ;;  %v429_v14 = vmul.f32 %v1078_v2, %v1078_v2 }
 0x2ea   :  { %v412_v8 = vpop.f32.mrf.mxu0 }
 0x2eb   :  { %v432_v10 = vmul.f32 %v1070_v7, %v1070_v7  ;;  %v1076_v11 = vmax.f32 %v412_v8, 0.0 }
 0x2ed   :  { %v431_v1 = vmul.f32 %v1076_v11, %v1076_v11  ;;  %838 = vmatprep.subr.mxu1 %v432_v10 }
 0x2ee   :  { %839 = vmatpush3.msra.mxu1 %v432_v10 }
 0x2ef   :  { %840 = vmatprep.subr.mxu1 %v431_v1 }
 0x2f0   :  { %841 = vmatpush3.msra.mxu1 %v431_v1 }
 0x2f1   :  { %842 = vmatprep.subr.mxu1 %v430_v13 }
 0x2f2   :  { %843 = vmatpush3.msra.mxu1 %v430_v13 }
 0x2f3   :  { %844 = vmatprep.subr.mxu1 %v429_v14 }
 0x2f4   :  { %845 = vmatpush3.msra.mxu1 %v429_v14 }
 0x2f5   :  { %847 = vmatmul.mubr.msk.f32.vlgmr.msra.gmra.mxu1 %vm75_vm0, %v1025_v19  ;;  %v427_v19 = vld [vmem:[%s1134_s5 + $0x10] sm:$0xff] }
 0x2f6   :  { %853 = vmatprep.mubr.msk.f32.mxu1 %vm169_vm1, %v960_v0  ;;  %v428_v0 = vld [vmem:[%s1134_s5 + $0x18] sm:$0xff] }
 0x2f7   :  { %859 = vmatprep.subr.mxu0 %v428_v0 }
 0x2f8   :  { %860 = vmatpush3.msra.mxu0 %v428_v0 }
 0x2f9   :  { %861 = vmatprep.subr.mxu0 %v427_v19 }
 0x2fa   :  { %862 = vmatpush3.msra.mxu0 %v427_v19 }
 0x3b5   :  { %v848_v16 = vpop.f32.mrf.mxu1 }
 0x3b6   :  { %v509_v17 = vmul.f32 %v848_v16, %v1034_v21 }
 0x3b7   :  { %v499_v18 = vpop.f32.mrf.mxu1 }
 0x3b8   :  { %v508_v20 = vmul.f32 %v499_v18, %v1037_v24  ;;  %849 = vmatprep.subr.mxu1 %v509_v17 }
 0x3b9   :  { %850 = vmatpush3.msra.mxu1 %v509_v17 }
 0x3ba   :  { %851 = vmatprep.subr.mxu1 %v508_v20 }
 0x3bb   :  { %852 = vmatpush3.msra.mxu1 %v508_v20 }
 0x3bc   :  { %854 = vmatmul.mubr.msk.f32.vlgmr.msra.gmra.mxu1 %vm169_vm1, %v976_v3  ;;  %v426_v3 = vld [vmem:[%s1134_s5 + $0x8] sm:$0xff] }
 0x3bd   :  { %856 = vmatprep.mubr.msk.f32.mxu1 %vm169_vm1, %v1004_v12  ;;  %v425_v12 = vld [vmem:[%s1134_s5] sm:$0xff]  ;;  %863 = vmatprep.subr.mxu0 %v426_v3  ;;  %s919_s5 = smov [#allocation2]  }
 0x3be   :  { %864 = vmatpush3.msra.mxu0 %v426_v3  ;;  %s741_s30 = sshll.u32 %s919_s5, 4  ;;  %s742_s30 = int_to_ptr.vmem [resolvable:$true] %s741_s30 }
 0x3bf   :  { %865 = vmatprep.subr.mxu0 %v425_v12  ;;  %s896_s7 = scalar_lea.vmem %s742_s30, 512  ;;  %p901_p1 = scmp.lt.s32.totalorder %s742_s30, %s742_s30 }
 0x3c0   :  { %857 = vmatmul.mubr.msk.f32.gmra.mxu1 %vm169_vm1, %v1015_v15  ;;  %866 = vmatpush3.msra.mxu0 %v425_v12  ;;  %p897_p0 = scmp.ne.s32.totalorder %s742_s30, %s896_s7  ;;  %p902_p2 = scmp.lt.s32.totalorder %s896_s7, %s896_s7 }
 0x3c2   :  { %p903_p3 = por %p902_p2, %p901_p1 }
 0x3c4   :  { %p904_p4 = pnand %p903_p3, %p897_p0 }
 0x47c   :  { %v855_v15 = vpop.f32.mrf.mxu1 }
 0x47d   :  { %v596_v21 = vmul.f32 %v855_v15, %v1052_v29 }
 0x47e   :  { %v576_v22 = vpop.f32.mrf.mxu1 }
 0x47f   :  { %888 = vrsqrt.f32 %v596_v21  ;;  %v595_v23 = vmul.f32 %v576_v22, %v1050_v28  ;;  %vm608_vm11 = vcmp.eq.f32.partialorder %v596_v21, inf  ;;  %v611_v29 = vand.u32 2147483648, %v596_v21 }
 0x480   :  { %v858_v24 = vpop.f32.mrf.mxu1  ;;  %vm610_vm12 = vcmp.eq.f32.partialorder %v596_v21, 0.0 }
 0x481   :  { %v598_v25 = vmul.f32 %v858_v24, %v1055_v33  ;;  %890 = vrsqrt.f32 %v595_v23  ;;  %vm601_vm13 = vcmp.eq.f32.partialorder %v595_v23, inf  ;;  %v604_v28 = vand.u32 2147483648, %v595_v23 }
 0x482   :  { %v586_v26 = vpop.f32.mrf.mxu1  ;;  %vm603_vm14 = vcmp.eq.f32.partialorder %v595_v23, 0.0 }
 0x483   :  { %892 = vrsqrt.f32 %v598_v25  ;;  %v597_v27 = vmul.f32 %v586_v26, %v1058_v36  ;;  %vm622_vm15 = vcmp.eq.f32.partialorder %v598_v25, inf  ;;  %v625_v45 = vand.u32 2147483648, %v598_v25 }
 0x484   :  { %vm624_vm3 = vcmp.eq.f32.partialorder %v598_v25, 0.0 }
 0x485   :  { %894 = vrsqrt.f32 %v597_v27  ;;  %vm615_vm1 = vcmp.eq.f32.partialorder %v597_v27, inf  ;;  %v618_v44 = vand.u32 2147483648, %v597_v27  ;;  %vm617_vm2 = vcmp.eq.f32.partialorder %v597_v27, 0.0 }
 0x48c   :  { %v889_v30 = vpop.eup %888 }
 0x48d   :  { %v607_v31 = vmul.f32 %v889_v30, %v596_v21 }
 0x48e   :  { %v891_v32 = vpop.eup %890 }
 0x48f   :  { %v609_v34 = vsel %vm608_vm11, %v596_v21, %v607_v31  ;;  %v600_v37 = vmul.f32 %v891_v32, %v595_v23 }
 0x490   :  { %v893_v35 = vpop.eup %892  ;;  %v612_v40 = vsel %vm610_vm12, %v611_v29, %v609_v34 }
 0x491   :  { %v621_v38 = vmul.f32 %v893_v35, %v598_v25  ;;  %v602_v33 = vsel %vm601_vm13, %v595_v23, %v600_v37  ;;  %v628_v46 = vadd.f32 %v612_v40, %v1072_v9 }
 0x492   :  { %v895_v39 = vpop.eup %894  ;;  %v605_v41 = vsel %vm603_vm14, %v604_v28, %v602_v33 }
 0x493   :  { %v614_v36 = vmul.f32 %v895_v39, %v597_v27  ;;  %v623_v42 = vsel %vm622_vm15, %v598_v25, %v621_v38  ;;  %v627_v43 = vadd.f32 %v605_v41, %v1078_v2 }
 0x494   :  { %v626_v49 = vsel %vm624_vm3, %v625_v45, %v623_v42 }
 0x495   :  { %v616_v47 = vsel %vm615_vm1, %v597_v27, %v614_v36  ;;  %867 = vmatprep.mubr.msk.f32.mxu0 %vm75_vm0, %v627_v43  ;;  %v630_v51 = vadd.f32 %v626_v49, %v1070_v7 }
 0x496   :  { %v619_v48 = vsel %vm617_vm2, %v618_v44, %v616_v47  ;;  %868 = vmatmul.mubr.msk.f32.vlgmr.msra.gmra.mxu0 %vm75_vm0, %v628_v46 }
 0x497   :  { %v629_v50 = vadd.f32 %v619_v48, %v1076_v11 }
 0x499   :  { %870 = vmatprep.mubr.msk.f32.mxu0 %vm75_vm0, %v629_v50 }
 0x49a   :  { %871 = vmatmul.mubr.msk.f32.gmra.mxu0 %vm75_vm0, %v630_v51 }
 0x556   :  { %v869_v52 = vpop.f32.mrf.mxu0 }
 0x557   :  { %v729_v53 = vmax.f32 %v869_v52, 0.0 }
 0x558   :  { %v709_v54 = vpop.f32.mrf.mxu0 }
 0x559   :  { %733 = vst.msk [vmem:[#allocation2 + $0x8] sm:$0xff] %vm75_vm0, %v729_v53  ;;  %v728_v55 = vmax.f32 %v709_v54, 0.0 }
 0x55a   :  { %v872_v56 = vpop.f32.mrf.mxu0 }
 0x55b   :  { %732 = vst.msk [vmem:[#allocation2] sm:$0xff] %vm75_vm0, %v728_v55  ;;  %v731_v57 = vmax.f32 %v872_v56, 0.0 }
 0x55c   :  { %v719_v58 = vpop.f32.mrf.mxu0 }
 0x55d   :  { %735 = vst.msk [vmem:[#allocation2 + $0x18] sm:$0xff] %vm75_vm0, %v731_v57  ;;  %v730_v59 = vmax.f32 %v719_v58, 0.0 }
 0x55f   :  { %734 = vst.msk [vmem:[#allocation2 + $0x10] sm:$0xff] %vm75_vm0, %v730_v59 }
 0x560   :  { %907 = shalt.err (!%p904_p4)
}
 0x561   :  { %s920_s8 = smov 128   ;;  %s921_s9 = smov 8  }
 0x562   :  { %747 = dma.vmem_to_hbm [thread:$0]  %s742_s30, 512, %s1135_s6, [#allocation3], %s920_s8, %s920_s8, %s921_s9  }
 0x563   :  { %916 = dma.done.wait [#allocation3], 512  }
 0x564   :  { %917 = vsyncadd [#allocation3], 4294966784 }
 0x565   :  { %751 = vsyncpa [#allocation3], 1 }

</bundles_post_ra>
